<compile_context>
chip_gen: v6e
topology: v6e:2x2x1
jax: 0.10.0
libtpu: 0.0.40
codegen_flags: <defaults>
</compile_context>

<pallas_src>
import functools

import numpy as np
import jax
import jax.numpy as jnp
from jax import lax
from jax.experimental import pallas as pl
from jax.experimental.pallas import tpu as pltpu

EPS_F32 = float(np.finfo(np.float32).eps)
LOG_STD_MIN, LOG_STD_MAX = -20.0, 2.0
HALF_LOG_2PI = 0.5 * float(np.log(2.0 * np.pi))


def _round_up(x, m):
    return ((x + m - 1) // m) * m


def sac_forward_kernel(xin_ref, w1_ref, b1_ref, w2_ref, b2_ref,
                       whead_ref, bhead_ref, scale_ref, out_ref,
                       *, obs_pad, a_pad, act_dim):
    # packed input slab: lanes [0, obs_pad) = obs, lanes [obs_pad, obs_pad+a_pad) = noise
    x = xin_ref[:, :obs_pad]
    noise = xin_ref[:, obs_pad:]

    # actor MLP trunk (MXU matmuls, f32 accumulate; lhs cast to weight dtype -> native
    # bf16 rate on v6e/v7x when param_dtype=bf16, a no-op for f32)
    wdt = w1_ref.dtype
    h1 = jnp.dot(x.astype(wdt), w1_ref[...], preferred_element_type=jnp.float32) + b1_ref[...]
    h1 = jnp.maximum(h1, 0.0)
    h2 = jnp.dot(h1.astype(wdt), w2_ref[...], preferred_element_type=jnp.float32) + b2_ref[...]
    h2 = jnp.maximum(h2, 0.0)

    # fused gaussian head: single matmul producing [mu | log_std], split at a lane-tile
    # boundary (a_pad is a multiple of 128) so both slices are layout-free
    head = jnp.dot(h2.astype(wdt), whead_ref[...], preferred_element_type=jnp.float32) + bhead_ref[...]
    mu = head[:, :a_pad]
    log_std = jnp.clip(head[:, a_pad:], LOG_STD_MIN, LOG_STD_MAX)
    std = jnp.exp(log_std)

    # rsample: action = mu + std * noise; since (action - mu)/std == noise exactly,
    # the Normal log-prob uses noise directly (no sub/div round-trip).
    action = mu + std * noise
    squashed = jnp.tanh(action)

    lane = lax.broadcasted_iota(jnp.int32, mu.shape, 1)
    valid = lane < act_dim  # mask out lane padding from the reductions

    logp_terms = -0.5 * noise * noise - log_std - HALF_LOG_2PI
    log_prob = jnp.sum(jnp.where(valid, logp_terms, 0.0), axis=-1, keepdims=True)

    # tanh squash change-of-variable correction (eps-based, matching the PyTorch module)
    scale = scale_ref[...]  # (1, a_pad), broadcast over batch
    corr_terms = jnp.log(scale * (1.0 - squashed * squashed) + EPS_F32)
    log_prob = log_prob - jnp.sum(jnp.where(valid, corr_terms, 0.0), axis=-1, keepdims=True)

    # lane-dense packed output, built in-register (pure VPU selects, no lane shuffles):
    # lanes [0:act_dim] = squashed action, lane act_dim = log_prob, rest = 0.
    # Single full-ref store -> unmasked vst.
    out = jnp.where(lane == act_dim, log_prob, jnp.where(valid, squashed, 0.0))
    out_ref[...] = out.astype(out_ref.dtype)


def sac_policy_forward(obs, params, noise, action_scale, *,
                       tile_b=512, param_dtype=jnp.float32):
    """SACPolicy.forward (stochastic branch) as a batch-tiled Pallas kernel.

    obs: (B, obs_dim) f32, noise: (B, act_dim) f32.
    Returns (squashed_action (B, act_dim), log_prob (B, 1)).
    param_dtype=jnp.bfloat16 enables the bf16 resident-weight fast path (v6e/v7x).
    """
    B, obs_dim = obs.shape
    act_dim = noise.shape[1]
    hidden = params["w1"].shape[1]

    f32 = jnp.float32
    obs_pad = _round_up(obs_dim, 128)
    hid_pad = _round_up(hidden, 128)
    a_pad = _round_up(act_dim + 1, 128)   # room for the packed log_prob lane
    out_w = a_pad

    def pad2(a, rows, cols):
        r, c = a.shape
        return jnp.pad(a.astype(f32), ((0, rows - r), (0, cols - c)))

    # zero-pad params to lane-aligned shapes (exact zeros -> identical math); fuse heads
    w1 = pad2(params["w1"], obs_pad, hid_pad).astype(param_dtype)
    b1 = pad2(params["b1"], 1, hid_pad)
    w2 = pad2(params["w2"], hid_pad, hid_pad).astype(param_dtype)
    b2 = pad2(params["b2"], 1, hid_pad)
    whead = jnp.concatenate([pad2(params["wmu"], hid_pad, a_pad),
                             pad2(params["wls"], hid_pad, a_pad)], axis=1).astype(param_dtype)
    bhead = jnp.concatenate([pad2(params["bmu"], 1, a_pad),
                             pad2(params["bls"], 1, a_pad)], axis=1)
    scale = pad2(action_scale, 1, a_pad)

    # batch tiling: big tiles to amortize per-step overhead, but keep >= 2 grid steps
    # when the batch allows so the "parallel" axis splits across v7x's two TensorCores.
    b_round = _round_up(B, 8)
    tile_b = max(8, min(tile_b, b_round))
    if b_round >= 16 and tile_b > b_round // 2:
        tile_b = _round_up(b_round // 2, 8)
    b_pad = _round_up(B, tile_b)

    # one packed input slab: [obs | noise], one batch DMA stream per tile
    xin = jnp.concatenate([pad2(obs, B, obs_pad), pad2(noise, B, a_pad)], axis=1)
    if b_pad != B:
        xin = jnp.pad(xin, ((0, b_pad - B), (0, 0)))

    grid = (b_pad // tile_b,)
    in_w = obs_pad + a_pad

    def resident(shape):
        # same block every grid step -> stays VMEM-resident, DMA'd once
        # TODO(synk): for large hidden, pipeline_mode=pl.Buffered(1) on these would halve
        #             resident-weight VMEM; irrelevant at these sizes so left default.
        return pl.BlockSpec(shape, lambda i: (0, 0))

    w_itemsize = jnp.dtype(param_dtype).itemsize
    weight_elems = obs_pad * hid_pad + hid_pad * hid_pad + hid_pad * 2 * a_pad
    flops_per_row = 2 * weight_elems + 24 * a_pad
    cost = pl.CostEstimate(
        flops=b_pad * flops_per_row,
        transcendentals=b_pad * 3 * a_pad,              # exp, tanh, log per action lane
        bytes_accessed=4 * b_pad * (in_w + out_w)
                       + w_itemsize * weight_elems
                       + 4 * (2 * hid_pad + 2 * a_pad + a_pad),
    )

    out = pl.pallas_call(
        functools.partial(sac_forward_kernel,
                          obs_pad=obs_pad, a_pad=a_pad, act_dim=act_dim),
        out_shape=jax.ShapeDtypeStruct((b_pad, out_w), jnp.float32),
        grid=grid,
        in_specs=[
            pl.BlockSpec((tile_b, in_w), lambda i: (i, 0)),   # packed [obs | noise]
            resident((obs_pad, hid_pad)),                     # w1
            resident((1, hid_pad)),                           # b1
            resident((hid_pad, hid_pad)),                     # w2
            resident((1, hid_pad)),                           # b2
            resident((hid_pad, 2 * a_pad)),                   # whead = [wmu | wls]
            resident((1, 2 * a_pad)),                         # bhead = [bmu | bls]
            resident((1, a_pad)),                             # action_scale
        ],
        out_specs=pl.BlockSpec((tile_b, out_w), lambda i: (i, 0)),
        compiler_params=pltpu.CompilerParams(
            dimension_semantics=("parallel",)),               # batch axis shards across TCs
        cost_estimate=cost,
    )(xin, w1, b1, w2, b2, whead, bhead, scale)

    act = out[:B, :act_dim]
    logp = out[:B, act_dim:act_dim + 1]
    return act, logp


def init_params(key, obs_dim, hidden, act_dim):
    ks = jax.random.split(key, 4)

    def lin(k, fan_in, fan_out):
        return jax.random.normal(k, (fan_in, fan_out), jnp.float32) * (1.0 / np.sqrt(fan_in))

    return {
        "w1": lin(ks[0], obs_dim, hidden), "b1": jnp.zeros((1, hidden), jnp.float32),
        "w2": lin(ks[1], hidden, hidden), "b2": jnp.zeros((1, hidden), jnp.float32),
        "wmu": lin(ks[2], hidden, act_dim), "bmu": jnp.zeros((1, act_dim), jnp.float32),
        "wls": lin(ks[3], hidden, act_dim),
        "bls": jnp.full((1, act_dim), -1.0, jnp.float32),
    }


def reference_forward(obs, params, noise, action_scale):
    h1 = jnp.maximum(obs @ params["w1"] + params["b1"], 0.0)
    h2 = jnp.maximum(h1 @ params["w2"] + params["b2"], 0.0)
    mu = h2 @ params["wmu"] + params["bmu"]
    log_std = jnp.clip(h2 @ params["wls"] + params["bls"], LOG_STD_MIN, LOG_STD_MAX)
    std = jnp.exp(log_std)
    action = mu + std * noise
    lp = jnp.sum(-0.5 * noise * noise - log_std - HALF_LOG_2PI, axis=-1, keepdims=True)
    sq = jnp.tanh(action)
    lp = lp - jnp.sum(jnp.log(action_scale * (1.0 - sq ** 2) + EPS_F32),
                      axis=-1, keepdims=True)
    return sq, lp


if __name__ == "__main__":
    # TODO(synk): learn()/optimizers/critics/target-net polyak sync are training-side
    #             and out of scope for the forward kernel.
    # TODO(synk): noise could be generated in-kernel (pltpu.prng_seed + stateful_normal);
    #             kept external here for deterministic parity with the reference.
    B, OBS_DIM, HIDDEN, ACT_DIM = 8, 16, 32, 8

    key = jax.random.PRNGKey(0)
    k_obs, k_par, k_noise = jax.random.split(key, 3)

    obs = jax.random.normal(k_obs, (B, OBS_DIM), jnp.float32)
    params = init_params(k_par, OBS_DIM, HIDDEN, ACT_DIM)
    noise = jax.random.normal(k_noise, (B, ACT_DIM), jnp.float32)
    # action_space.high = 1, low = -1  ->  action_scale = 1 per dim
    action_scale = jnp.ones((1, ACT_DIM), jnp.float32)

    act, logp = sac_policy_forward(obs, params, noise, action_scale)
    jax.block_until_ready((act, logp))

    ref_act, ref_logp = reference_forward(obs, params, noise, action_scale)
    np.testing.assert_allclose(np.asarray(act), np.asarray(ref_act), rtol=1e-5, atol=1e-5)
    np.testing.assert_allclose(np.asarray(logp), np.asarray(ref_logp), rtol=1e-4, atol=1e-4)

    # bf16 resident-weight fast path (v6e/v7x) — same kernel, looser tolerance
    act_bf, logp_bf = sac_policy_forward(obs, params, noise, action_scale,
                                         param_dtype=jnp.bfloat16)
    jax.block_until_ready((act_bf, logp_bf))
    np.testing.assert_allclose(np.asarray(act_bf), np.asarray(ref_act), rtol=0.1, atol=0.1)
    np.testing.assert_allclose(np.asarray(logp_bf), np.asarray(ref_logp), rtol=0.1, atol=0.1)

    assert act.shape == (B, ACT_DIM) and logp.shape == (B, 1)
    print("KERNEL_OK")
</pallas_src>

<mosaic_0001>
module attributes {stable_mosaic.version = 11 : i64} {
  func.func @sac_forward_kernel(%arg0: i32, %arg1: memref<8x256xf32, #tpu.memory_space<vmem>>, %arg2: memref<128x128xf32, #tpu.memory_space<vmem>>, %arg3: memref<1x128xf32, #tpu.memory_space<vmem>>, %arg4: memref<128x128xf32, #tpu.memory_space<vmem>>, %arg5: memref<1x128xf32, #tpu.memory_space<vmem>>, %arg6: memref<128x256xf32, #tpu.memory_space<vmem>>, %arg7: memref<1x256xf32, #tpu.memory_space<vmem>>, %arg8: memref<1x128xf32, #tpu.memory_space<vmem>>, %arg9: memref<8x128xf32, #tpu.memory_space<vmem>>) attributes {dimension_semantics = [#tpu.dimension_semantics<parallel>], iteration_bounds = array<i64: 1>, scalar_prefetch = 0 : i64, scratch_operands = 0 : i64, tpu.core_type = #tpu.core_type<tc>, window_params = [{transform_indices = @transform_0, window_bounds = array<i64: 8, 256>}, {pipeline_mode = #tpu.pipeline_mode<synchronous>, transform_indices = @transform_1, window_bounds = array<i64: 128, 128>}, {pipeline_mode = #tpu.pipeline_mode<synchronous>, transform_indices = @transform_2, window_bounds = array<i64: 1, 128>}, {pipeline_mode = #tpu.pipeline_mode<synchronous>, transform_indices = @transform_3, window_bounds = array<i64: 128, 128>}, {pipeline_mode = #tpu.pipeline_mode<synchronous>, transform_indices = @transform_4, window_bounds = array<i64: 1, 128>}, {pipeline_mode = #tpu.pipeline_mode<synchronous>, transform_indices = @transform_5, window_bounds = array<i64: 128, 256>}, {pipeline_mode = #tpu.pipeline_mode<synchronous>, transform_indices = @transform_6, window_bounds = array<i64: 1, 256>}, {pipeline_mode = #tpu.pipeline_mode<synchronous>, transform_indices = @transform_7, window_bounds = array<i64: 1, 128>}, {transform_indices = @transform_8, window_bounds = array<i64: 8, 128>}]} {
    %c0 = arith.constant 0 : index
    %c0_0 = arith.constant 0 : index
    %0 = vector.load %arg1[%c0, %c0_0] : memref<8x256xf32, #tpu.memory_space<vmem>>, vector<8x128xf32>
    %c0_1 = arith.constant 0 : index
    %c128 = arith.constant 128 : index
    %1 = vector.load %arg1[%c0_1, %c128] : memref<8x256xf32, #tpu.memory_space<vmem>>, vector<8x128xf32>
    %c0_2 = arith.constant 0 : index
    %c0_3 = arith.constant 0 : index
    %2 = vector.load %arg2[%c0_2, %c0_3] : memref<128x128xf32, #tpu.memory_space<vmem>>, vector<128x128xf32>
    %cst = arith.constant dense<0.000000e+00> : vector<8x128xf32>
    %3 = tpu.matmul %0, %2, %cst {dimension_numbers = #tpu.dot_dimension_numbers<[1], [0], [0], [1], [0, 0, 1, 1], [], []>} : vector<8x128xf32>, vector<128x128xf32>, vector<8x128xf32> -> vector<8x128xf32>
    %c0_4 = arith.constant 0 : index
    %c0_5 = arith.constant 0 : index
    %4 = vector.load %arg3[%c0_4, %c0_5] : memref<1x128xf32, #tpu.memory_space<vmem>>, vector<1x128xf32>
    %5 = vector.broadcast %4 : vector<1x128xf32> to vector<8x128xf32>
    %6 = arith.addf %3, %5 : vector<8x128xf32>
    %cst_6 = arith.constant 0.000000e+00 : f32
    %7 = vector.broadcast %cst_6 : f32 to vector<8x128xf32>
    %8 = arith.maximumf %6, %7 : vector<8x128xf32>
    %c0_7 = arith.constant 0 : index
    %c0_8 = arith.constant 0 : index
    %9 = vector.load %arg4[%c0_7, %c0_8] : memref<128x128xf32, #tpu.memory_space<vmem>>, vector<128x128xf32>
    %cst_9 = arith.constant dense<0.000000e+00> : vector<8x128xf32>
    %10 = tpu.matmul %8, %9, %cst_9 {dimension_numbers = #tpu.dot_dimension_numbers<[1], [0], [0], [1], [0, 0, 1, 1], [], []>} : vector<8x128xf32>, vector<128x128xf32>, vector<8x128xf32> -> vector<8x128xf32>
    %c0_10 = arith.constant 0 : index
    %c0_11 = arith.constant 0 : index
    %11 = vector.load %arg5[%c0_10, %c0_11] : memref<1x128xf32, #tpu.memory_space<vmem>>, vector<1x128xf32>
    %12 = vector.broadcast %11 : vector<1x128xf32> to vector<8x128xf32>
    %13 = arith.addf %10, %12 : vector<8x128xf32>
    %cst_12 = arith.constant 0.000000e+00 : f32
    %14 = vector.broadcast %cst_12 : f32 to vector<8x128xf32>
    %15 = arith.maximumf %13, %14 : vector<8x128xf32>
    %c0_13 = arith.constant 0 : index
    %c0_14 = arith.constant 0 : index
    %16 = vector.load %arg6[%c0_13, %c0_14] : memref<128x256xf32, #tpu.memory_space<vmem>>, vector<128x256xf32>
    %cst_15 = arith.constant dense<0.000000e+00> : vector<8x256xf32>
    %17 = tpu.matmul %15, %16, %cst_15 {dimension_numbers = #tpu.dot_dimension_numbers<[1], [0], [0], [1], [0, 0, 1, 1], [], []>} : vector<8x128xf32>, vector<128x256xf32>, vector<8x256xf32> -> vector<8x256xf32>
    %c0_16 = arith.constant 0 : index
    %c0_17 = arith.constant 0 : index
    %18 = vector.load %arg7[%c0_16, %c0_17] : memref<1x256xf32, #tpu.memory_space<vmem>>, vector<1x256xf32>
    %19 = vector.broadcast %18 : vector<1x256xf32> to vector<8x256xf32>
    %20 = arith.addf %17, %19 : vector<8x256xf32>
    %21 = vector.extract_strided_slice %20 {offsets = [0, 0], sizes = [8, 128], strides = [1, 1]} : vector<8x256xf32> to vector<8x128xf32>
    %22 = vector.extract_strided_slice %20 {offsets = [0, 128], sizes = [8, 128], strides = [1, 1]} : vector<8x256xf32> to vector<8x128xf32>
    %cst_18 = arith.constant -2.000000e+01 : f32
    %cst_19 = arith.constant 2.000000e+00 : f32
    %23 = vector.broadcast %cst_18 : f32 to vector<8x128xf32>
    %24 = arith.maximumf %23, %22 : vector<8x128xf32>
    %25 = vector.broadcast %cst_19 : f32 to vector<8x128xf32>
    %26 = arith.minimumf %25, %24 : vector<8x128xf32>
    %27 = math.exp %26 : vector<8x128xf32>
    %28 = arith.mulf %27, %1 : vector<8x128xf32>
    %29 = arith.addf %21, %28 : vector<8x128xf32>
    %30 = math.tanh %29 : vector<8x128xf32>
    %31 = tpu.iota {dimensions = array<i32: 1>} : vector<8x128xi32>
    %c8_i32 = arith.constant 8 : i32
    %32 = vector.broadcast %c8_i32 : i32 to vector<8x128xi32>
    %33 = arith.cmpi slt, %31, %32 : vector<8x128xi32>
    %cst_20 = arith.constant -5.000000e-01 : f32
    %34 = vector.broadcast %cst_20 : f32 to vector<8x128xf32>
    %35 = arith.mulf %34, %1 : vector<8x128xf32>
    %36 = arith.mulf %35, %1 : vector<8x128xf32>
    %37 = arith.subf %36, %26 : vector<8x128xf32>
    %cst_21 = arith.constant 0.918938517 : f32
    %38 = vector.broadcast %cst_21 : f32 to vector<8x128xf32>
    %39 = arith.subf %37, %38 : vector<8x128xf32>
    %cst_22 = arith.constant 0.000000e+00 : f32
    %40 = vector.broadcast %cst_22 : f32 to vector<8x128xf32>
    %41 = arith.select %33, %39, %40 : vector<8x128xi1>, vector<8x128xf32>
    %cst_23 = arith.constant dense<0.000000e+00> : vector<8xf32>
    %42 = vector.multi_reduction <add>, %41, %cst_23 [1] : vector<8x128xf32> to vector<8xf32>
    %43 = vector.shape_cast %42 : vector<8xf32> to vector<8x1xf32>
    %c0_24 = arith.constant 0 : index
    %c0_25 = arith.constant 0 : index
    %44 = vector.load %arg8[%c0_24, %c0_25] : memref<1x128xf32, #tpu.memory_space<vmem>>, vector<1x128xf32>
    %45 = arith.mulf %30, %30 : vector<8x128xf32>
    %cst_26 = arith.constant 1.000000e+00 : f32
    %46 = vector.broadcast %cst_26 : f32 to vector<8x128xf32>
    %47 = arith.subf %46, %45 : vector<8x128xf32>
    %48 = vector.broadcast %44 : vector<1x128xf32> to vector<8x128xf32>
    %49 = arith.mulf %48, %47 : vector<8x128xf32>
    %cst_27 = arith.constant 1.1920929E-7 : f32
    %50 = vector.broadcast %cst_27 : f32 to vector<8x128xf32>
    %51 = arith.addf %49, %50 : vector<8x128xf32>
    %52 = math.log %51 : vector<8x128xf32>
    %cst_28 = arith.constant 0.000000e+00 : f32
    %53 = vector.broadcast %cst_28 : f32 to vector<8x128xf32>
    %54 = arith.select %33, %52, %53 : vector<8x128xi1>, vector<8x128xf32>
    %cst_29 = arith.constant dense<0.000000e+00> : vector<8xf32>
    %55 = vector.multi_reduction <add>, %54, %cst_29 [1] : vector<8x128xf32> to vector<8xf32>
    %56 = vector.shape_cast %55 : vector<8xf32> to vector<8x1xf32>
    %57 = arith.subf %43, %56 : vector<8x1xf32>
    %c8_i32_30 = arith.constant 8 : i32
    %58 = vector.broadcast %c8_i32_30 : i32 to vector<8x128xi32>
    %59 = arith.cmpi eq, %31, %58 : vector<8x128xi32>
    %cst_31 = arith.constant 0.000000e+00 : f32
    %60 = vector.broadcast %cst_31 : f32 to vector<8x128xf32>
    %61 = arith.select %33, %30, %60 : vector<8x128xi1>, vector<8x128xf32>
    %62 = vector.shape_cast %57 : vector<8x1xf32> to vector<8x1xf32>
    %63 = vector.broadcast %62 : vector<8x1xf32> to vector<8x128xf32>
    %64 = arith.select %59, %63, %61 : vector<8x128xi1>, vector<8x128xf32>
    %c0_32 = arith.constant 0 : index
    %c0_33 = arith.constant 0 : index
    %65 = vector.load %arg9[%c0_32, %c0_33] : memref<8x128xf32, #tpu.memory_space<vmem>>, vector<8x128xf32>
    tpu.vector_store %arg9[%c0_32, %c0_33], %64 {strides = array<i32>} : memref<8x128xf32, #tpu.memory_space<vmem>>, vector<8x128xf32>,
    return
  }
  func.func @transform_0(%arg0: i32) -> (i32, i32) {
    %c0_i32 = arith.constant 0 : i32
    %c0_i32_0 = arith.constant 0 : i32
    return %arg0, %c0_i32 : i32, i32
  }
  func.func @transform_1(%arg0: i32) -> (i32, i32) {
    %c0_i32 = arith.constant 0 : i32
    %c0_i32_0 = arith.constant 0 : i32
    %c0_i32_1 = arith.constant 0 : i32
    return %c0_i32, %c0_i32_0 : i32, i32
  }
  func.func @transform_2(%arg0: i32) -> (i32, i32) {
    %c0_i32 = arith.constant 0 : i32
    %c0_i32_0 = arith.constant 0 : i32
    %c0_i32_1 = arith.constant 0 : i32
    return %c0_i32, %c0_i32_0 : i32, i32
  }
  func.func @transform_3(%arg0: i32) -> (i32, i32) {
    %c0_i32 = arith.constant 0 : i32
    %c0_i32_0 = arith.constant 0 : i32
    %c0_i32_1 = arith.constant 0 : i32
    return %c0_i32, %c0_i32_0 : i32, i32
  }
  func.func @transform_4(%arg0: i32) -> (i32, i32) {
    %c0_i32 = arith.constant 0 : i32
    %c0_i32_0 = arith.constant 0 : i32
    %c0_i32_1 = arith.constant 0 : i32
    return %c0_i32, %c0_i32_0 : i32, i32
  }
  func.func @transform_5(%arg0: i32) -> (i32, i32) {
    %c0_i32 = arith.constant 0 : i32
    %c0_i32_0 = arith.constant 0 : i32
    %c0_i32_1 = arith.constant 0 : i32
    return %c0_i32, %c0_i32_0 : i32, i32
  }
  func.func @transform_6(%arg0: i32) -> (i32, i32) {
    %c0_i32 = arith.constant 0 : i32
    %c0_i32_0 = arith.constant 0 : i32
    %c0_i32_1 = arith.constant 0 : i32
    return %c0_i32, %c0_i32_0 : i32, i32
  }
  func.func @transform_7(%arg0: i32) -> (i32, i32) {
    %c0_i32 = arith.constant 0 : i32
    %c0_i32_0 = arith.constant 0 : i32
    %c0_i32_1 = arith.constant 0 : i32
    return %c0_i32, %c0_i32_0 : i32, i32
  }
  func.func @transform_8(%arg0: i32) -> (i32, i32) {
    %c0_i32 = arith.constant 0 : i32
    %c0_i32_0 = arith.constant 0 : i32
    return %arg0, %c0_i32 : i32, i32
  }
}

</mosaic_0001>

<bundles_post_ra>
// kernel: tpu_custom_call.1
= control target key start
LH: loop header
LB: loop body
LE: loop exit
PB: predicated region body
PF: predicated region fallthrough
CT: control target
= control target key end

     0   :  { %13 = vsyncpa [#allocation3], 0  ;;  %s797_s0 = inlined_call_operand.hbm [shape: f32[8,256], index: 0, kind: input, shape index: {}]   ;;  %s798_s1 = inlined_call_operand.hbm [shape: f32[128,128], index: 1, kind: input, shape index: {}]   ;;  %s799_s2 = inlined_call_operand.vmem [shape: f32[1,128], index: 2, kind: input, shape index: {}]   ;;  %s800_s3 = inlined_call_operand.hbm [shape: f32[128,128], index: 3, kind: input, shape index: {}]   ;;  %s801_s4 = inlined_call_operand.vmem [shape: f32[1,128], index: 4, kind: input, shape index: {}]   ;;  %s802_s5 = inlined_call_operand.hbm [shape: f32[128,256], index: 5, kind: input, shape index: {}]   ;;  %s803_s6 = inlined_call_operand.vmem [shape: f32[1,256], index: 6, kind: input, shape index: {}]   ;;  %s804_s7 = inlined_call_operand.vmem [shape: f32[1,128], index: 7, kind: input, shape index: {}]   ;;  %s805_s8 = inlined_call_operand.hbm [shape: f32[8,128], index: 8, kind: output, shape index: {}]  }
   0x1   :  { %14 = vsyncpa [#allocation6], 0 }
   0x2   :  { %15 = vsyncpa [#allocation9], 0 }
   0x3   :  { %16 = vsyncpa [#allocation4], 0  ;;  %s676_s27 = smov [#allocation5]  }
   0x4   :  { %s32_s28 = sshll.u32 %s676_s27, 4  ;;  %s33_s28 = int_to_ptr.vmem [resolvable:$true] %s32_s28 }
   0x5   :  { %s576_s29 = scalar_lea.vmem %s33_s28, 2048  ;;  %p581_p1 = scmp.lt.s32.totalorder %s33_s28, %s33_s28 }
   0x6   :  { %p577_p0 = scmp.ne.s32.totalorder %s33_s28, %s576_s29  ;;  %p582_p2 = scmp.lt.s32.totalorder %s576_s29, %s576_s29 }
   0x8   :  { %p583_p3 = por %p582_p2, %p581_p1 }
   0xa   :  { %p584_p4 = pnand %p583_p3, %p577_p0 }
   0xc   :  { %587 = shalt.err (!%p584_p4)
}
   0xd   :  { %s677_s30 = smov 128   ;;  %s678_s9 = smov 8  }
   0xe   :  { %38 = dma.hbm_to_vmem [thread:$0]  %s798_s1, 2048, %s33_s28, [#allocation6], %s677_s30, %s677_s30, %s678_s9  }
   0xf   :  { %s679_s12 = smov [#allocation2]   ;;  %s680_s14 = smov [#allocation7]  }
  0x10   :  { %s23_s13 = sshll.u32 %s679_s12, 4  ;;  %s46_s15 = sshll.u32 %s680_s14, 4  ;;  %s24_s13 = int_to_ptr.vmem [resolvable:$true] %s23_s13  ;;  %s47_s15 = int_to_ptr.vmem [resolvable:$true] %s46_s15 }
  0x11   :  { %s596_s16 = scalar_lea.vmem %s24_s13, 256  ;;  %p601_p6 = scmp.lt.s32.totalorder %s24_s13, %s24_s13 }
  0x12   :  { %p597_p5 = scmp.ne.s32.totalorder %s24_s13, %s596_s16  ;;  %p602_p7 = scmp.lt.s32.totalorder %s596_s16, %s596_s16 }
  0x14   :  { %p603_p8 = por %p602_p7, %p601_p6 }
  0x16   :  { %p604_p9 = pnand %p603_p8, %p597_p5 }
  0x18   :  { %607 = shalt.err (!%p604_p9)
}
  0x19   :  { %26 = dma.hbm_to_vmem [thread:$0]  %s797_s0, 256, %s24_s13, [#allocation3]  }
  0x1a   :  { %s616_s19 = scalar_lea.vmem %s47_s15, 2048  ;;  %p621_p11 = scmp.lt.s32.totalorder %s47_s15, %s47_s15 }
  0x1b   :  { %p617_p10 = scmp.ne.s32.totalorder %s47_s15, %s616_s19  ;;  %p622_p12 = scmp.lt.s32.totalorder %s616_s19, %s616_s19 }
  0x1d   :  { %p623_p13 = por %p622_p12, %p621_p11 }
  0x1f   :  { %p624_p0 = pnand %p623_p13, %p617_p10 }
  0x21   :  { %627 = shalt.err (!%p624_p0)
}
  0x22   :  { %52 = dma.hbm_to_vmem [thread:$0]  %s800_s3, 2048, %s47_s15, [#allocation6], %s677_s30, %s677_s30, %s678_s9  }
  0x23   :  { %s681_s21 = smov [#allocation8]  }
  0x24   :  { %s60_s22 = sshll.u32 %s681_s21, 4  ;;  %s61_s22 = int_to_ptr.vmem [resolvable:$true] %s60_s22 }
  0x25   :  { %s636_s23 = scalar_lea.vmem %s61_s22, 4096  ;;  %p641_p2 = scmp.lt.s32.totalorder %s61_s22, %s61_s22 }
  0x26   :  { %p637_p1 = scmp.ne.s32.totalorder %s61_s22, %s636_s23  ;;  %p642_p3 = scmp.lt.s32.totalorder %s636_s23, %s636_s23 }
  0x28   :  { %p643_p4 = por %p642_p3, %p641_p2 }
  0x2a   :  { %p644_p5 = pnand %p643_p4, %p637_p1 }
  0x2c   :  { %647 = shalt.err (!%p644_p5)
}
  0x2d   :  { %s682_s0 = smov 256   ;;  %s683_s24 = smov 16  }
  0x2e   :  { %66 = dma.hbm_to_vmem [thread:$0]  %s802_s5, 4096, %s61_s22, [#allocation9], %s682_s0, %s682_s0, %s683_s24  }
  0x2f   :  { %668 = dma.done.wait [#allocation3], 256  }
  0x30   :  { %669 = vsyncadd [#allocation3], 4294967040 }
  0x31   :  { %670 = dma.done.wait [#allocation6], 4096  }
  0x32   :  { %671 = vsyncadd [#allocation6], 4294963200 }
  0x33   :  { %672 = dma.done.wait [#allocation9], 4096  }
  0x34   :  { %673 = vsyncadd [#allocation9], 4294963200  ;;  %v684_v0 = vmov 0.0   ;;  %vm685_vm0 = vmmov 0   ;;  %v100_v1 = vld [vmem:[#allocation5 + $0x78] sm:$0xff]  ;;  %v99_v2 = vld [vmem:[#allocation5 + $0x70] sm:$0xff] }
  0x35   :  { %481 = vmatprep.subr.mxu0 %v684_v0  ;;  %513 = vmatprep.mubr.msk.f32.mxu0 %vm685_vm0, %v684_v0  ;;  %v98_v3 = vld [vmem:[#allocation5 + $0x68] sm:$0xff]  ;;  %v97_v4 = vld [vmem:[#allocation5 + $0x60] sm:$0xff]  ;;  %v194_v5 = vld [vmem:[#allocation7 + $0x78] sm:$0xff]  ;;  %s686_s30 = smov [#allocation10]  }
  0x36   :  { %516 = vmatprep.subr.mxu1 %v684_v0  ;;  %548 = vmatprep.mubr.msk.f32.mxu1 %vm685_vm0, %v684_v0  ;;  %v96_v6 = vld [vmem:[#allocation5 + $0x58] sm:$0xff]  ;;  %v193_v7 = vld [vmem:[#allocation7 + $0x70] sm:$0xff]  ;;  %v192_v8 = vld [vmem:[#allocation7 + $0x68] sm:$0xff]  ;;  %s432_s9 = sshll.u32 %s686_s30, 4  ;;  %s433_s9 = int_to_ptr.vmem [resolvable:$true] %s432_s9 }
  0x37   :  { %482 = vmatpush3.msra.mxu0 %v100_v1  ;;  %517 = vmatpush3.msra.mxu1 %v194_v5  ;;  %v95_v9 = vld [vmem:[#allocation5 + $0x50] sm:$0xff]  ;;  %v191_v10 = vld [vmem:[#allocation7 + $0x60] sm:$0xff]  ;;  %v94_v11 = vld [vmem:[#allocation5 + $0x48] sm:$0xff]  ;;  %s648_s10 = scalar_lea.vmem %s433_s9, 128  ;;  %p653_p7 = scmp.lt.s32.totalorder %s433_s9, %s433_s9 }
  0x38   :  { %483 = vmatprep.subr.mxu0 %v684_v0  ;;  %518 = vmatprep.subr.mxu1 %v684_v0  ;;  %v190_v12 = vld [vmem:[#allocation7 + $0x58] sm:$0xff]  ;;  %v93_v13 = vld [vmem:[#allocation5 + $0x40] sm:$0xff]  ;;  %v189_v14 = vld [vmem:[#allocation7 + $0x50] sm:$0xff]  ;;  %p649_p6 = scmp.ne.s32.totalorder %s433_s9, %s648_s10  ;;  %p654_p8 = scmp.lt.s32.totalorder %s648_s10, %s648_s10 }
  0x39   :  { %484 = vmatpush3.msra.mxu0 %v99_v2  ;;  %519 = vmatpush3.msra.mxu1 %v193_v7  ;;  %v92_v15 = vld [vmem:[#allocation5 + $0x38] sm:$0xff]  ;;  %v188_v16 = vld [vmem:[#allocation7 + $0x48] sm:$0xff]  ;;  %v91_v17 = vld [vmem:[#allocation5 + $0x30] sm:$0xff] }
  0x3a   :  { %485 = vmatprep.subr.mxu0 %v684_v0  ;;  %520 = vmatprep.subr.mxu1 %v684_v0  ;;  %v187_v18 = vld [vmem:[#allocation7 + $0x40] sm:$0xff]  ;;  %v90_v19 = vld [vmem:[#allocation5 + $0x28] sm:$0xff]  ;;  %v186_v20 = vld [vmem:[#allocation7 + $0x38] sm:$0xff]  ;;  %p655_p9 = por %p654_p8, %p653_p7 }
  0x3b   :  { %486 = vmatpush3.msra.mxu0 %v98_v3  ;;  %521 = vmatpush3.msra.mxu1 %v192_v8  ;;  %v89_v21 = vld [vmem:[#allocation5 + $0x20] sm:$0xff]  ;;  %v185_v22 = vld [vmem:[#allocation7 + $0x30] sm:$0xff]  ;;  %v88_v23 = vld [vmem:[#allocation5 + $0x18] sm:$0xff] }
  0x3c   :  { %487 = vmatprep.subr.mxu0 %v684_v0  ;;  %522 = vmatprep.subr.mxu1 %v684_v0  ;;  %v184_v24 = vld [vmem:[#allocation7 + $0x28] sm:$0xff]  ;;  %v87_v25 = vld [vmem:[#allocation5 + $0x10] sm:$0xff]  ;;  %v183_v26 = vld [vmem:[#allocation7 + $0x20] sm:$0xff]  ;;  %p656_p10 = pnand %p655_p9, %p649_p6 }
  0x3d   :  { %488 = vmatpush3.msra.mxu0 %v97_v4  ;;  %523 = vmatpush3.msra.mxu1 %v191_v10  ;;  %v86_v27 = vld [vmem:[#allocation5 + $0x8] sm:$0xff]  ;;  %v182_v28 = vld [vmem:[#allocation7 + $0x18] sm:$0xff]  ;;  %v85_v29 = vld [vmem:[#allocation5] sm:$0xff] }
  0x3e   :  { %489 = vmatprep.subr.mxu0 %v684_v0  ;;  %524 = vmatprep.subr.mxu1 %v684_v0  ;;  %v83_v30 = vld [vmem:[#allocation2] sm:$0xff]  ;;  %v180_v32 = vld [vmem:[#allocation7 + $0x8] sm:$0xff]  ;;  %v179_v33 = vld [vmem:[#allocation7] sm:$0xff] }
  0x3f   :  { %490 = vmatpush3.msra.mxu0 %v96_v6  ;;  %525 = vmatpush3.msra.mxu1 %v190_v12  ;;  %v181_v31 = vld [vmem:[#allocation7 + $0x10] sm:$0xff]  ;;  %v304_v34 = vld [vmem:[#allocation8 + $0xf8] sm:$0xff]  ;;  %v302_v36 = vld [vmem:[#allocation8 + $0xe8] sm:$0xff]  ;;  %v307_v12 = vlaneseq }
  0x40   :  { %491 = vmatprep.subr.mxu0 %v684_v0  ;;  %526 = vmatprep.subr.mxu1 %v684_v0  ;;  %v303_v35 = vld [vmem:[#allocation8 + $0xf0] sm:$0xff]  ;;  %v301_v37 = vld [vmem:[#allocation8 + $0xe0] sm:$0xff]  ;;  %v300_v38 = vld [vmem:[#allocation8 + $0xd8] sm:$0xff] }
  0x41   :  { %492 = vmatpush3.msra.mxu0 %v95_v9  ;;  %527 = vmatpush3.msra.mxu1 %v189_v14  ;;  %v299_v39 = vld [vmem:[#allocation8 + $0xd0] sm:$0xff]  ;;  %v298_v40 = vld [vmem:[#allocation8 + $0xc8] sm:$0xff]  ;;  %v297_v41 = vld [vmem:[#allocation8 + $0xc0] sm:$0xff] }
  0x42   :  { %493 = vmatprep.subr.mxu0 %v684_v0  ;;  %528 = vmatprep.subr.mxu1 %v684_v0  ;;  %v296_v42 = vld [vmem:[#allocation8 + $0xb8] sm:$0xff]  ;;  %v295_v43 = vld [vmem:[#allocation8 + $0xb0] sm:$0xff]  ;;  %v294_v44 = vld [vmem:[#allocation8 + $0xa8] sm:$0xff] }
  0x43   :  { %494 = vmatpush3.msra.mxu0 %v94_v11  ;;  %529 = vmatpush3.msra.mxu1 %v188_v16  ;;  %v293_v45 = vld [vmem:[#allocation8 + $0xa0] sm:$0xff]  ;;  %v292_v46 = vld [vmem:[#allocation8 + $0x98] sm:$0xff]  ;;  %v291_v47 = vld [vmem:[#allocation8 + $0x90] sm:$0xff] }
  0x44   :  { %495 = vmatprep.subr.mxu0 %v684_v0  ;;  %530 = vmatprep.subr.mxu1 %v684_v0  ;;  %v290_v48 = vld [vmem:[#allocation8 + $0x88] sm:$0xff]  ;;  %v289_v49 = vld [vmem:[#allocation8 + $0x80] sm:$0xff]  ;;  %v288_v50 = vld [vmem:[#allocation8 + $0x78] sm:$0xff] }
  0x45   :  { %496 = vmatpush3.msra.mxu0 %v93_v13  ;;  %531 = vmatpush3.msra.mxu1 %v187_v18  ;;  %v287_v51 = vld [vmem:[#allocation8 + $0x70] sm:$0xff]  ;;  %v286_v52 = vld [vmem:[#allocation8 + $0x68] sm:$0xff]  ;;  %v285_v53 = vld [vmem:[#allocation8 + $0x60] sm:$0xff]  ;;  %v308_v13 = vshrl.u32 %v307_v12, 7 }
  0x46   :  { %497 = vmatprep.subr.mxu0 %v684_v0  ;;  %532 = vmatprep.subr.mxu1 %v684_v0  ;;  %v284_v54 = vld [vmem:[#allocation8 + $0x58] sm:$0xff]  ;;  %v283_v55 = vld [vmem:[#allocation8 + $0x50] sm:$0xff]  ;;  %v282_v56 = vld [vmem:[#allocation8 + $0x48] sm:$0xff] }
  0x47   :  { %498 = vmatpush3.msra.mxu0 %v92_v15  ;;  %533 = vmatpush3.msra.mxu1 %v186_v20  ;;  %v281_v57 = vld [vmem:[#allocation8 + $0x40] sm:$0xff]  ;;  %v280_v58 = vld [vmem:[#allocation8 + $0x38] sm:$0xff]  ;;  %v279_v59 = vld [vmem:[#allocation8 + $0x30] sm:$0xff]  ;;  %v313_v14 = vsub.s32 1, %v308_v13 }
  0x48   :  { %499 = vmatprep.subr.mxu0 %v684_v0  ;;  %534 = vmatprep.subr.mxu1 %v684_v0  ;;  %v278_v60 = vld [vmem:[#allocation8 + $0x28] sm:$0xff]  ;;  %v443_v61 = vld [vmem:[%s799_s2] ss:$0 sm:$0xff]  ;;  %v277_v2 = vld [vmem:[#allocation8 + $0x20] sm:$0xff] }
  0x49   :  { %500 = vmatpush3.msra.mxu0 %v91_v17  ;;  %535 = vmatpush3.msra.mxu1 %v185_v22  ;;  %v276_v3 = vld [vmem:[#allocation8 + $0x18] sm:$0xff]  ;;  %v275_v4 = vld [vmem:[#allocation8 + $0x10] sm:$0xff]  ;;  %v274_v5 = vld [vmem:[#allocation8 + $0x8] sm:$0xff] }
  0x4a   :  { %501 = vmatprep.subr.mxu0 %v684_v0  ;;  %536 = vmatprep.subr.mxu1 %v684_v0  ;;  %v273_v6 = vld [vmem:[#allocation8] sm:$0xff]  ;;  %v444_v7 = vld [vmem:[%s801_s4] ss:$0 sm:$0xff]  ;;  %v84_v16 = vld [vmem:[#allocation2 + $0x8] sm:$0xff] }
  0x4b   :  { %502 = vmatpush3.msra.mxu0 %v90_v19  ;;  %537 = vmatpush3.msra.mxu1 %v184_v24  ;;  %v305_v15 = vld [vmem:[%s803_s6] sm:$0x3]  ;;  %v398_v19 = vmul.f32 -0.5, %v84_v16  ;;  %v396_v24 = vand.u32 127, %v307_v12 }
  0x4c   :  { %503 = vmatprep.subr.mxu0 %v684_v0  ;;  %538 = vmatprep.subr.mxu1 %v684_v0  ;;  %v314_v17 = vrot.slane %v305_v15, %v313_v14 }
  0x4d   :  { %504 = vmatpush3.msra.mxu0 %v89_v21  ;;  %539 = vmatpush3.msra.mxu1 %v183_v26  ;;  %vm397_vm1 = vcmp.lt.s32.totalorder %v396_v24, 8  ;;  %vm422_vm2 = vcmp.eq.s32.totalorder %v396_v24, 8 }
  0x4e   :  { %505 = vmatprep.subr.mxu0 %v684_v0  ;;  %540 = vmatprep.subr.mxu1 %v684_v0 }
  0x4f   :  { %506 = vmatpush3.msra.mxu0 %v88_v23  ;;  %541 = vmatpush3.msra.mxu1 %v182_v28  ;;  %v399_v23 = vmul.f32 %v398_v19, %v84_v16 }
  0x50   :  { %507 = vmatprep.subr.mxu0 %v684_v0  ;;  %542 = vmatprep.subr.mxu1 %v684_v0 }
  0x51   :  { %508 = vmatpush3.msra.mxu0 %v87_v25  ;;  %543 = vmatpush3.msra.mxu1 %v181_v31 }
  0x52   :  { %509 = vmatprep.subr.mxu0 %v684_v0  ;;  %544 = vmatprep.subr.mxu1 %v684_v0 }
  0x53   :  { %510 = vmatpush3.msra.mxu0 %v86_v27  ;;  %545 = vmatpush3.msra.mxu1 %v180_v32 }
  0x54   :  { %511 = vmatprep.subr.mxu0 %v684_v0  ;;  %546 = vmatprep.subr.mxu1 %v684_v0 }
  0x55   :  { %512 = vmatpush3.msra.mxu0 %v85_v29  ;;  %547 = vmatpush3.msra.mxu1 %v179_v33 }
  0x56   :  { %514 = vmatmul.mubr.f32.vlgmr.msra.gmra.mxu0 %v83_v30  ;;  %317 = vmatprep.subr.mxu0 %v304_v34  ;;  %v309_v30 = vsub.s32 0, %v308_v13 }
  0x57   :  { %381 = vmatprep.mubr.f32.mxu0 %v684_v0  ;;  %318 = vmatpush1.msra.mxu0 %v303_v35 }
  0x58   :  { %319 = vmatprep.subr.mxu0 %v302_v36  ;;  %v310_v31 = vrot.slane %v305_v15, %v309_v30 }
  0x59   :  { %320 = vmatpush1.msra.mxu0 %v301_v37 }
  0x5a   :  { %321 = vmatprep.subr.mxu0 %v300_v38 }
  0x5b   :  { %322 = vmatpush1.msra.mxu0 %v299_v39  ;;  %v446_v39 = vld [vmem:[%s804_s7] ss:$0 sm:$0xff] }
  0x5c   :  { %323 = vmatprep.subr.mxu0 %v298_v40 }
  0x5d   :  { %324 = vmatpush1.msra.mxu0 %v297_v41 }
  0x5e   :  { %325 = vmatprep.subr.mxu0 %v296_v42 }
  0x5f   :  { %326 = vmatpush1.msra.mxu0 %v295_v43 }
  0x60   :  { %327 = vmatprep.subr.mxu0 %v294_v44 }
  0x61   :  { %328 = vmatpush1.msra.mxu0 %v293_v45 }
  0x62   :  { %329 = vmatprep.subr.mxu0 %v292_v46 }
  0x63   :  { %330 = vmatpush1.msra.mxu0 %v291_v47 }
  0x64   :  { %331 = vmatprep.subr.mxu0 %v290_v48 }
  0x65   :  { %332 = vmatpush1.msra.mxu0 %v289_v49 }
  0x66   :  { %333 = vmatprep.subr.mxu0 %v288_v50 }
  0x67   :  { %334 = vmatpush1.msra.mxu0 %v287_v51 }
  0x68   :  { %335 = vmatprep.subr.mxu0 %v286_v52 }
  0x69   :  { %336 = vmatpush1.msra.mxu0 %v285_v53 }
  0x6a   :  { %337 = vmatprep.subr.mxu0 %v284_v54 }
  0x6b   :  { %338 = vmatpush1.msra.mxu0 %v283_v55 }
  0x6c   :  { %339 = vmatprep.subr.mxu0 %v282_v56 }
  0x6d   :  { %340 = vmatpush1.msra.mxu0 %v281_v57 }
  0x6e   :  { %341 = vmatprep.subr.mxu0 %v280_v58 }
  0x6f   :  { %342 = vmatpush1.msra.mxu0 %v279_v59 }
  0x70   :  { %343 = vmatprep.subr.mxu0 %v278_v60 }
  0x71   :  { %344 = vmatpush1.msra.mxu0 %v277_v2 }
  0x72   :  { %345 = vmatprep.subr.mxu0 %v276_v3 }
  0x73   :  { %346 = vmatpush1.msra.mxu0 %v275_v4 }
  0x74   :  { %347 = vmatprep.subr.mxu0 %v274_v5 }
  0x75   :  { %348 = vmatpush1.msra.mxu0 %v273_v6 }
 0x116   :  { %v174_v62 = vpop.f32.mrf.mxu0 }
 0x117   :  { %v175_v63 = vadd.f32 %v443_v61, %v174_v62 }
 0x118   :  { %v515_v0 = vpop.f32.mrf.mxu0 }
 0x119   :  { %v178_v1 = vmax.f32 %v175_v63, 0.0 }
 0x11b   :  { %549 = vmatmul.mubr.f32.vlgmr.msra.gmra.mxu1 %v178_v1 }
 0x1db   :  { %v268_v8 = vpop.f32.mrf.mxu1 }
 0x1dc   :  { %v269_v9 = vadd.f32 %v444_v7, %v268_v8 }
 0x1dd   :  { %v550_v10 = vpop.f32.mrf.mxu1 }
 0x1de   :  { %v272_v11 = vmax.f32 %v269_v9, 0.0 }
 0x1e0   :  { %382 = vmatmul.mubr.f32.vlgmr.msra.gmra.mxu0 %v272_v11 }
 0x2a0   :  { %v383_v18 = vpop.f32.mrf.mxu0 }
 0x2a1   :  { %v384_v33 = vadd.f32 %v383_v18, %v310_v31 }
 0x2a2   :  { %v385_v20 = vpop.f32.mrf.mxu0 }
 0x2a3   :  { %v386_v21 = vadd.f32 %v385_v20, %v314_v17 }
 0x2a5   :  { %v388_v22 = vmax.f32 %v386_v21, -20.0 }
 0x2a7   :  { %v389_v25 = vmin.f32 %v388_v22, 2.0 }
 0x2a9   :  { %v390_v26 = vmul.f32 1.442695, %v389_v25  ;;  %v400_v27 = vsub.f32 %v399_v23, %v389_v25 }
 0x2ab   :  { %562 = vpow2.f32 %v390_v26  ;;  %v445_v28 = vadd.f32 -0.9189385, %v400_v27 }
 0x2ad   :  { %v402_v29 = vsel %vm397_vm1, %v445_v28, 0.0 }
 0x2ae   :  { %403 = vadd.xlane.f32.xlu0 %v402_v29 }
 0x2b8   :  { %v563_v32 = vpop.eup %562 }
 0x2b9   :  { %v392_v34 = vmul.f32 %v563_v32, %v84_v16 }
 0x2bb   :  { %v393_v35 = vadd.f32 %v392_v34, %v384_v33 }
 0x2bd   :  { %564 = vtanh.f32 %v393_v35 }
 0x2ca   :  { %v565_v36 = vpop.eup %564 }
 0x2cb   :  { %v423_v37 = vsel %vm397_vm1, %v565_v36, 0.0  ;;  %v406_v38 = vmul.f32 %v565_v36, %v565_v36 }
 0x2cd   :  { %v407_v40 = vsub.f32 1.0, %v406_v38 }
 0x2cf   :  { %v414_v41 = vmul.f32 %v446_v39, %v407_v40 }
 0x2d1   :  { %v415_v42 = vadd.f32 1.1920929e-07, %v414_v41 }
 0x2d3   :  { %566 = vlog2.f32 %v415_v42 }
 0x2e0   :  { %v567_v43 = vpop.eup %566 }
 0x2e1   :  { %v417_v44 = vmul.f32 0.6931472, %v567_v43 }
 0x2e3   :  { %v418_v45 = vsel %vm397_vm1, %v417_v44, 0.0 }
 0x2e4   :  { %419 = vadd.xlane.f32.xlu0 %v418_v45 }
 0x337   :  { %v404_v46 = vpop.xlane.xlu0 %403 }
 0x36d   :  { %v420_v47 = vpop.xlane.xlu0 %419 }
 0x36e   :  { %v421_v48 = vsub.f32 %v404_v46, %v420_v47 }
 0x370   :  { %v424_v49 = vsel %vm422_vm2, %v421_v48, %v423_v37 }
 0x371   :  { %425 = vst [vmem:[#allocation10] sm:$0xff] %v424_v49 }
 0x372   :  { %659 = shalt.err (!%p656_p10)
}
 0x373   :  { %435 = dma.vmem_to_hbm [thread:$0]  %s433_s9, 128, %s805_s8, [#allocation4]  }
 0x374   :  { %674 = dma.done.wait [#allocation4], 128  }
 0x375   :  { %675 = vsyncadd [#allocation4], 4294967168 }
 0x376   :  { %439 = vsyncpa [#allocation3], 1 }
 0x377   :  { %440 = vsyncpa [#allocation6], 1 }
 0x378   :  { %441 = vsyncpa [#allocation9], 1 }
 0x379   :  { %442 = vsyncpa [#allocation4], 1 }

</bundles_post_ra>
